<compile_context>
chip_gen: v7x
topology: tpu7x:2x2x1
jax: 0.10.0
libtpu: 0.0.40
codegen_flags: <defaults>
</compile_context>

<pallas_src>
import jax
import jax.numpy as jnp
from jax.experimental import pallas as pl
from jax.experimental.pallas import tpu as pltpu

_SUBLANE = 8
_LANE = 128
_MIN_PALLAS_ELEMS = 1 << 17   # ~512 KiB f32; below this XLA's fused mul wins.
_COL_CANDIDATES = (1024, 512, 256, 128)


def _mask_mul_kernel(x_ref, m_ref, o_ref):
    # Elementwise multiply on the VMEM tile (VPU); cast narrow masks up to
    # x.dtype in-register (the convert is free next to the HBM streams).
    o_ref[...] = x_ref[...] * m_ref[...].astype(x_ref.dtype)


def mask_layer(x, mask, *, tile_rows=1024, donate_x=False, force_pallas=False):
    """Pallas equivalent of MaskLayer.forward(x, mask) = x * mask.

    x and mask must have identical shapes (any rank).  The mask may use a
    narrower dtype (bool / int8 / bf16) -- it is cast to x.dtype inside the
    kernel and the output dtype follows x.
    """
    assert x.shape == mask.shape, "MaskLayer kernel assumes identical shapes"

    orig_shape = x.shape
    n = x.size
    if n == 0:
        return x

    # Widest lane-dense column count that divides n exactly -> the flatten +
    # reshape below is a zero-copy relayout (no jnp.pad, no trailing slice).
    cols = next((c for c in _COL_CANDIDATES if n % c == 0), None)

    # Fast paths: tiny inputs, or totals that are not a multiple of 128 lanes.
    # XLA's fused elementwise multiply is already at the HBM roofline there.
    if cols is None or (not force_pallas and n < _MIN_PALLAS_ELEMS):
        return x * mask.astype(x.dtype)

    rows = n // cols
    x2 = x.reshape(rows, cols)
    m2 = mask.reshape(rows, cols)

    # Tile-row selection:
    #  * rows <  8 : single full-extent block (block dim == array dim is legal).
    #  * rows >= 8 : sublane-aligned tile, clamped so the grid has >= 2 steps
    #    whenever possible (keeps both v7x TensorCores busy under "parallel").
    #    A trailing partial block is masked by Pallas, not padded by us.
    if rows < _SUBLANE:
        tile_rows = rows
    else:
        tile_rows = max(_SUBLANE, (tile_rows // _SUBLANE) * _SUBLANE)
        half_rows = pl.cdiv(pl.cdiv(rows, 2), _SUBLANE) * _SUBLANE
        tile_rows = max(_SUBLANE, min(tile_rows, half_rows))
    grid = (pl.cdiv(rows, tile_rows),)

    # Double-buffered VMEM footprint: 2 buffers x (x + mask + out) tiles.
    tile_bytes = tile_rows * cols * (2 * x.dtype.itemsize + mask.dtype.itemsize)
    vmem_limit = int(max(2 * tile_bytes + (2 << 20), 32 << 20))

    bytes_accessed = n * (2 * x.dtype.itemsize + mask.dtype.itemsize)

    out2 = pl.pallas_call(
        _mask_mul_kernel,
        out_shape=jax.ShapeDtypeStruct((rows, cols), x.dtype),
        grid=grid,
        in_specs=[
            pl.BlockSpec((tile_rows, cols), lambda i: (i, 0)),
            pl.BlockSpec((tile_rows, cols), lambda i: (i, 0)),
        ],
        out_specs=pl.BlockSpec((tile_rows, cols), lambda i: (i, 0)),
        # Only donate x when the caller promises it is dead afterwards;
        # otherwise XLA inserts a defensive full copy of x.
        input_output_aliases=({0: 0} if donate_x else {}),
        cost_estimate=pl.CostEstimate(
            flops=n, transcendentals=0, bytes_accessed=bytes_accessed
        ),
        compiler_params=pltpu.CompilerParams(
            dimension_semantics=("parallel",),
            vmem_limit_bytes=vmem_limit,
        ),
    )(x2, m2)

    return out2.reshape(orig_shape)


if __name__ == "__main__":
    key = jax.random.PRNGKey(0)
    kx, km, kx2, km2, kx3, km3 = jax.random.split(key, 6)

    # Small demo shape (forced through the Pallas path to exercise the kernel);
    # mask is int8 so only 9 bytes/element cross HBM instead of 12.
    B, C, H, W = 2, 4, 16, 16
    x = jax.random.normal(kx, (B, C, H, W), dtype=jnp.float32)
    mask = (jax.random.uniform(km, (B, C, H, W)) > 0.5).astype(jnp.int8)
    out = mask_layer(x, mask, force_pallas=True)
    jax.block_until_ready(out)
    ref = x * mask.astype(jnp.float32)
    assert out.shape == ref.shape and out.dtype == ref.dtype
    assert jnp.array_equal(out, ref), "mismatch vs reference (small)"

    # Multi-step grid with a masked partial last block (rows=20, tile_rows=16).
    x_r = jax.random.normal(kx2, (2, 10, 32, 32), dtype=jnp.float32)
    m_r = (jax.random.uniform(km2, x_r.shape) > 0.5).astype(jnp.int8)
    out_r = mask_layer(x_r, m_r, force_pallas=True)
    jax.block_until_ready(out_r)
    assert jnp.array_equal(out_r, x_r * m_r.astype(jnp.float32)), "mismatch (ragged rows)"

    # Larger aligned shape: rows=1024 -> two 512-row grid steps (>= 2 steps so a
    # v7x megacore split keeps both TensorCores busy).
    x_big = jax.random.normal(kx3, (8, 32, 64, 64), dtype=jnp.float32)  # 4 MiB
    m_big = (jax.random.uniform(km3, x_big.shape) > 0.5).astype(jnp.int8)
    out_big = mask_layer(x_big, m_big)
    jax.block_until_ready(out_big)
    assert jnp.array_equal(out_big, x_big * m_big.astype(jnp.float32)), "mismatch (large)"

    print("KERNEL_OK")
</pallas_src>

<mosaic_0001>
module attributes {stable_mosaic.version = 11 : i64} {
  func.func @_mask_mul_kernel(%arg0: i32, %arg1: memref<2x1024xf32, #tpu.memory_space<vmem>>, %arg2: memref<2x1024xi8, #tpu.memory_space<vmem>>, %arg3: memref<2x1024xf32, #tpu.memory_space<vmem>>) attributes {dimension_semantics = [#tpu.dimension_semantics<parallel>], iteration_bounds = array<i64: 1>, scalar_prefetch = 0 : i64, scratch_operands = 0 : i64, tpu.core_type = #tpu.core_type<tc>, window_params = [{transform_indices = @transform_0, window_bounds = array<i64: 2, 1024>}, {transform_indices = @transform_1, window_bounds = array<i64: 2, 1024>}, {transform_indices = @transform_2, window_bounds = array<i64: 2, 1024>}]} {
    %c0 = arith.constant 0 : index
    %c0_0 = arith.constant 0 : index
    %0 = vector.load %arg1[%c0, %c0_0] : memref<2x1024xf32, #tpu.memory_space<vmem>>, vector<2x1024xf32>
    %c0_1 = arith.constant 0 : index
    %c0_2 = arith.constant 0 : index
    %1 = vector.load %arg2[%c0_1, %c0_2] : memref<2x1024xi8, #tpu.memory_space<vmem>>, vector<2x1024xi8>
    %2 = arith.sitofp %1 : vector<2x1024xi8> to vector<2x1024xf32>
    %3 = arith.mulf %0, %2 : vector<2x1024xf32>
    %c0_3 = arith.constant 0 : index
    %c0_4 = arith.constant 0 : index
    %4 = vector.load %arg3[%c0_3, %c0_4] : memref<2x1024xf32, #tpu.memory_space<vmem>>, vector<2x1024xf32>
    tpu.vector_store %arg3[%c0_3, %c0_4], %3 {strides = array<i32>} : memref<2x1024xf32, #tpu.memory_space<vmem>>, vector<2x1024xf32>,
    return
  }
  func.func @transform_0(%arg0: i32) -> (i32, i32) {
    %c0_i32 = arith.constant 0 : i32
    %c0_i32_0 = arith.constant 0 : i32
    return %arg0, %c0_i32 : i32, i32
  }
  func.func @transform_1(%arg0: i32) -> (i32, i32) {
    %c0_i32 = arith.constant 0 : i32
    %c0_i32_0 = arith.constant 0 : i32
    return %arg0, %c0_i32 : i32, i32
  }
  func.func @transform_2(%arg0: i32) -> (i32, i32) {
    %c0_i32 = arith.constant 0 : i32
    %c0_i32_0 = arith.constant 0 : i32
    return %arg0, %c0_i32 : i32, i32
  }
}

</mosaic_0001>

<bundles_post_ra>
// kernel: tpu_custom_call.1
= control target key start
LH: loop header
LB: loop body
LE: loop exit
PB: predicated region body
PF: predicated region fallthrough
CT: control target
= control target key end

     0   :  { %7 = vsyncpa [#allocation3], 0  ;;  %s234_s0 = inlined_call_operand.hbm [shape: f32[2,1024], index: 0, kind: input, shape index: {}]   ;;  %s235_s1 = inlined_call_operand.hbm [shape: s8[2,1024], index: 1, kind: input, shape index: {}]   ;;  %s236_s2 = inlined_call_operand.hbm [shape: f32[2,1024], index: 2, kind: output, shape index: {}]  }
   0x1   :  { %8 = vsyncpa [#allocation6], 0 }
   0x2   :  { %9 = vsyncpa [#allocation4], 0  ;;  %s179_s9 = smov [#allocation2]   ;;  %s180_s11 = smov [#allocation5]  }
   0x3   :  { %s16_s10 = sshll.u32 %s179_s9, 4  ;;  %s26_s12 = sshll.u32 %s180_s11, 4  ;;  %s17_s10 = int_to_ptr.vmem [resolvable:$true] %s16_s10  ;;  %s27_s12 = int_to_ptr.vmem [resolvable:$true] %s26_s12 }
   0x4   :  { %s107_s15 = scalar_lea.hbm %s234_s0, 256 }
   0x5   :  { %p108_p0 = scmp.ne.s32.totalorder %s234_s0, %s107_s15  ;;  %p111_p1 = scmp.lt.u32.totalorder %s107_s15, %s234_s0 }
   0x7   :  { %p113_p2 = pnand %p111_p1, %p108_p0 }
   0x9   :  { %116 = shalt.err (!%p113_p2)
}
   0xa   :  { %s117_s20 = scalar_lea.vmem %s17_s10, 256  ;;  %p122_p4 = scmp.lt.s32.totalorder %s17_s10, %s17_s10 }
   0xb   :  { %p118_p3 = scmp.ne.s32.totalorder %s17_s10, %s117_s20  ;;  %p123_p5 = scmp.lt.s32.totalorder %s117_s20, %s117_s20 }
   0xd   :  { %p124_p6 = por %p123_p5, %p122_p4 }
   0xf   :  { %p125_p7 = pnand %p124_p6, %p118_p3 }
  0x11   :  { %128 = shalt.err (!%p125_p7)
}
  0x12   :  { %19 = dma.hbm_to_vmem [thread:$0]  %s234_s0, 256, %s17_s10, [#allocation3]  }
  0x13   :  { %s129_s25 = scalar_lea.hbm %s235_s1, 128 }
  0x14   :  { %p130_p8 = scmp.ne.s32.totalorder %s235_s1, %s129_s25  ;;  %p133_p9 = scmp.lt.u32.totalorder %s129_s25, %s235_s1 }
  0x16   :  { %p135_p10 = pnand %p133_p9, %p130_p8 }
  0x18   :  { %138 = shalt.err (!%p135_p10)
}
  0x19   :  { %s139_s30 = scalar_lea.vmem %s27_s12, 128  ;;  %p144_p12 = scmp.lt.s32.totalorder %s27_s12, %s27_s12 }
  0x1a   :  { %p140_p11 = scmp.ne.s32.totalorder %s27_s12, %s139_s30  ;;  %p145_p13 = scmp.lt.s32.totalorder %s139_s30, %s139_s30 }
  0x1c   :  { %p146_p0 = por %p145_p13, %p144_p12 }
  0x1e   :  { %p147_p1 = pnand %p146_p0, %p140_p11 }
  0x20   :  { %150 = shalt.err (!%p147_p1)
}
  0x21   :  { %29 = dma.hbm_to_vmem [thread:$0]  %s235_s1, 128, %s27_s12, [#allocation6]  }
  0x22   :  { %173 = dma.done.wait [#allocation3], 256  }
  0x23   :  { %174 = vsyncadd [#allocation3], 4294967040 }
  0x24   :  { %175 = dma.done.wait [#allocation6], 128  }
  0x25   :  { %176 = vsyncadd [#allocation6], 4294967168  ;;  %v54_v0 = vlaneseq  ;;  %v181_v1 = vmov 1983009808   ;;  %v38_v5 = vld [vmem:[#allocation5] sm:$0xff]  ;;  %v36_v19 = vld [vmem:[#allocation2] sm:$0xff] }
  0x26   :  { %v52_v2 = vunpack.c.l.s4 %v181_v1  ;;  %v39_v7 = vunpack.c.0.s8 %v38_v5  ;;  %v40_v8 = vunpack.c.1.s8 %v38_v5  ;;  %v41_v9 = vunpack.c.2.s8 %v38_v5  ;;  %v37_v20 = vld [vmem:[#allocation2 + $0x8] sm:$0xff]  ;;  %s182_s1 = smov [#allocation7]  }
  0x27   :  { %v55_v4 = vshrl.u32 %v54_v0, 7  ;;  %v42_v10 = vunpack.c.3.s8 %v38_v5  ;;  %s93_s4 = sshll.u32 %s182_s1, 4  ;;  %s94_s4 = int_to_ptr.vmem [resolvable:$true] %s93_s4 }
  0x28   :  { %v53_v3 = vunpack.c.0.s8 %v52_v2  ;;  %v43_v11 = vcvt.s32.f32 %v39_v7  ;;  %v44_v12 = vcvt.s32.f32 %v40_v8  ;;  %v45_v13 = vcvt.s32.f32 %v41_v9  ;;  %s151_s5 = scalar_lea.vmem %s94_s4, 256  ;;  %p156_p3 = scmp.lt.s32.totalorder %s94_s4, %s94_s4 }
  0x29   :  { %v46_v14 = vcvt.s32.f32 %v42_v10  ;;  %p152_p2 = scmp.ne.s32.totalorder %s94_s4, %s151_s5  ;;  %p157_p4 = scmp.lt.s32.totalorder %s151_s5, %s151_s5 }
  0x2a   :  { %v56_v6 = vsub.s32 %v53_v3, %v55_v4 }
  0x2b   :  { %p158_p5 = por %p157_p4, %p156_p3 }
  0x2c   :  { %v57_v15 = vrot.slane %v43_v11, %v56_v6  ;;  %v64_v16 = vrot.slane %v44_v12, %v56_v6  ;;  %v72_v17 = vrot.slane %v45_v13, %v56_v6  ;;  %v79_v18 = vrot.slane %v46_v14, %v56_v6 }
  0x2d   :  { %p159_p6 = pnand %p158_p5, %p152_p2 }
  0x2e   :  { %v65_v21 = vcombine.low %v57_v15, %v64_v16  ;;  %v80_v22 = vcombine.low %v72_v17, %v79_v18 }
  0x30   :  { %v83_v23 = vmul.f32 %v65_v21, %v36_v19  ;;  %v84_v24 = vmul.f32 %v80_v22, %v37_v20 }
  0x32   :  { %85 = vst [vmem:[#allocation7] sm:$0xff] %v83_v23  ;;  %86 = vst [vmem:[#allocation7 + $0x8] sm:$0xff] %v84_v24 }
  0x33   :  { %162 = shalt.err (!%p159_p6)
}
  0x34   :  { %s163_s8 = scalar_lea.hbm %s236_s2, 256 }
  0x35   :  { %p164_p7 = scmp.ne.s32.totalorder %s236_s2, %s163_s8  ;;  %p167_p8 = scmp.lt.u32.totalorder %s163_s8, %s236_s2 }
  0x37   :  { %p169_p9 = pnand %p167_p8, %p164_p7 }
  0x39   :  { %172 = shalt.err (!%p169_p9)
}
  0x3a   :  { %96 = dma.vmem_to_hbm [thread:$0]  %s94_s4, 256, %s236_s2, [#allocation4]  }
  0x3b   :  { %177 = dma.done.wait [#allocation4], 256  }
  0x3c   :  { %178 = vsyncadd [#allocation4], 4294967040 }
  0x3d   :  { %100 = vsyncpa [#allocation3], 1 }
  0x3e   :  { %101 = vsyncpa [#allocation6], 1 }
  0x3f   :  { %102 = vsyncpa [#allocation4], 1 }

</bundles_post_ra>
